<compile_context>
chip_gen: v5e
topology: v5e:2x2
jax: 0.10.0
libtpu: 0.0.40
codegen_flags: <defaults>
</compile_context>

<pallas_src>
import functools
import math

import jax
import jax.numpy as jnp
from jax import lax
from jax.experimental import pallas as pl
from jax.experimental.pallas import tpu as pltpu


_TARGET_BLOCK_BYTES = 4 << 20   # aim for ~4 MiB per pipelined I/O block (2-8 MiB sweet spot)
_F32_TEMPS = 4                  # ~peak count of (tile, L) f32 temporaries inside the kernel


def _rows_kernel(x_ref, gamma_ref, beta_ref, o_ref, *, eps, hidden):
    """One logical LayerNorm row per block row (H >= 128, or packing not applicable)."""
    x = x_ref[...].astype(jnp.float32)            # (tile, H)
    gamma = gamma_ref[...].astype(jnp.float32)    # (1, H)
    beta = beta_ref[...].astype(jnp.float32)      # (1, H)

    mean = jnp.mean(x, axis=-1, keepdims=True)
    xc = x - mean
    # torch.std default is unbiased (ddof=1): var = sum((x-mean)^2) / (H - 1)
    var = jnp.sum(xc * xc, axis=-1, keepdims=True) * jnp.float32(1.0 / max(hidden - 1, 1))
    inv = pl.reciprocal(jnp.sqrt(var) + jnp.float32(eps), approx=False)
    o_ref[...] = (xc * inv * gamma + beta).astype(o_ref.dtype)


def _packed_kernel(x_ref, gamma_ref, beta_ref, bmat_ref, o_ref, *, eps, hidden):
    """k = 128 // H logical rows packed per 128-lane block row (lane-dense I/O).

    Segmented (per-H-lane-group) sums are computed with a single MXU matmul against a
    block-diagonal ones matrix, which reduces *and* broadcasts back in one op.
    Precision.HIGHEST keeps full f32 accuracy (DEFAULT would contract in bf16).
    """
    x = x_ref[...].astype(jnp.float32)            # (tile, L), L = k*H = 128
    gamma = gamma_ref[...].astype(jnp.float32)    # (1, L)  -- gamma tiled k times
    beta = beta_ref[...].astype(jnp.float32)      # (1, L)
    bmat = bmat_ref[...]                          # (L, L) f32 block-diagonal ones

    seg_sum = jnp.dot(x, bmat, precision=lax.Precision.HIGHEST,
                      preferred_element_type=jnp.float32)
    mean = seg_sum * jnp.float32(1.0 / hidden)
    xc = x - mean
    seg_ssq = jnp.dot(xc * xc, bmat, precision=lax.Precision.HIGHEST,
                      preferred_element_type=jnp.float32)
    var = seg_ssq * jnp.float32(1.0 / max(hidden - 1, 1))   # unbiased (torch.std ddof=1)
    inv = pl.reciprocal(jnp.sqrt(var) + jnp.float32(eps), approx=False)
    o_ref[...] = (xc * inv * gamma + beta).astype(o_ref.dtype)


def _physical_vmem_bytes():
    try:
        return int(pltpu.get_tpu_info().vmem_capacity_bytes)
    except Exception:
        return 64 * 1024 * 1024   # v7x per-TC VMEM is the smallest across generations


def _choose_row_tile(rows, lane_width, itemsize, phys_vmem, sublane_mult):
    # Per row of the block: double-buffered in/out blocks plus the f32 temporaries
    # the kernel materializes (cast / centering / output expression).
    bytes_per_row = 2 * 2 * lane_width * itemsize + _F32_TEMPS * lane_width * 4
    work_budget = (phys_vmem * 3) // 8            # leave headroom below the scoped limit
    budget_rows = max(sublane_mult, work_budget // max(bytes_per_row, 1))
    target_rows = max(sublane_mult, _TARGET_BLOCK_BYTES // max(lane_width * itemsize, 1))
    tile = int(min(budget_rows, target_rows))
    if tile >= rows:
        return int(rows)          # single block == full array dims (always legal)
    return max(sublane_mult, (tile // sublane_mult) * sublane_mult)


def layer_norm(x, gamma, beta, *, eps=1e-6, row_tile=None):
    """x: [..., H]; gamma, beta: [H]. Matches the torch module's forward math."""
    orig_shape = x.shape
    H = orig_shape[-1]
    rows = math.prod(orig_shape[:-1]) if len(orig_shape) > 1 else 1

    itemsize = jnp.dtype(x.dtype).itemsize
    sub = max(8, 32 // max(itemsize, 1))          # sublane packing: 8 f32 / 16 bf16 / 32 int8
    phys = _physical_vmem_bytes()

    gamma1 = gamma.reshape(-1)
    beta1 = beta.reshape(-1)

    # Lane-dense repack for short hidden dims: pack k = 128 // H rows per 128-lane row.
    # The reshape is free (contiguous array), and it makes the HBM<->VMEM DMAs and all
    # vector loads/stores fully lane-dense instead of masked / strided.
    pack = 1
    if H < 128 and 128 % H == 0 and rows % (128 // H) == 0:
        pack = 128 // H
    # TODO(synk): when H < 128 but rows isn't a multiple of 128 // H, handle the row tail
    # with a second small pallas_call instead of falling back to the lane-sparse layout.

    if pack > 1:
        L = pack * H
        rows_v = rows // pack
        xv = x.reshape(rows_v, L)
        gv = jnp.tile(gamma1, pack).reshape(1, L)
        bv = jnp.tile(beta1, pack).reshape(1, L)
        seg = jnp.arange(L, dtype=jnp.int32) // H
        bmat = (seg[:, None] == seg[None, :]).astype(jnp.float32)   # (L, L) block-diag ones
        kernel = functools.partial(_packed_kernel, eps=float(eps), hidden=H)
        extra_inputs = (bmat,)
        extra_specs = [pl.BlockSpec((L, L), lambda i: (0, 0))]
    else:
        L = H
        rows_v = rows
        xv = x.reshape(rows_v, L)
        gv = gamma1.reshape(1, L)
        bv = beta1.reshape(1, L)
        kernel = functools.partial(_rows_kernel, eps=float(eps), hidden=H)
        extra_inputs = ()
        extra_specs = []

    if row_tile is not None:
        tile = int(row_tile)
        tile = rows_v if tile >= rows_v else max(sub, (tile // sub) * sub)
    else:
        tile = _choose_row_tile(rows_v, L, itemsize, phys, sub)
    grid = pl.cdiv(rows_v, tile)

    # VMEM accounting: double-buffered in/out blocks + in-kernel f32 temporaries
    # + the small constant operands, with headroom, capped below physical VMEM.
    needed = (2 * 2 * tile * L * itemsize
              + _F32_TEMPS * tile * L * 4
              + (2 * L * L * 4 if pack > 1 else 0)
              + 4 * L * itemsize
              + (1 << 20))
    vmem_limit = int(min(max(needed + (8 << 20), 32 << 20), (phys * 3) // 4))

    # No padding and no output slice: grid = cdiv(rows, tile); Pallas masks the ragged
    # final block (OOB rows read garbage, but their stores are dropped and rows are
    # independent, so valid rows are unaffected).  This avoids extra full HBM passes.
    out = pl.pallas_call(
        kernel,
        out_shape=jax.ShapeDtypeStruct((rows_v, L), x.dtype),
        grid_spec=pltpu.PrefetchScalarGridSpec(
            num_scalar_prefetch=0,
            grid=(grid,),
            in_specs=[
                pl.BlockSpec((tile, L), lambda i: (i, 0)),
                pl.BlockSpec((1, L), lambda i: (0, 0)),
                pl.BlockSpec((1, L), lambda i: (0, 0)),
            ] + extra_specs,
            out_specs=pl.BlockSpec((tile, L), lambda i: (i, 0)),
        ),
        compiler_params=pltpu.CompilerParams(
            # TODO(synk): confirm in xprof that the 1-D "parallel" row grid is split across
            # both TensorCores on v7x; if not, add an explicit CORE_PARALLEL leading axis.
            dimension_semantics=("parallel",),
            vmem_limit_bytes=vmem_limit,
        ),
        # TODO(synk): on v5e, if the per-step DMA is still exposed in xprof, set
        # pipeline_mode=pl.Buffered(3) on the x BlockSpec (128 MiB VMEM has the headroom).
    )(xv, gv, bv, *extra_inputs)

    return out.reshape(orig_shape)


if __name__ == "__main__":
    def reference(x, gamma, beta, eps=1e-6):
        h = x.shape[-1]
        mean = jnp.mean(x, axis=-1, keepdims=True)
        std = jnp.sqrt(jnp.sum((x - mean) ** 2, axis=-1, keepdims=True) / (h - 1))
        return gamma * (x - mean) / (std + eps) + beta

    # Spec-sized example: batch=2, seq=8, hidden=32 (lane-dense packed path).
    batch, seq, hidden = 2, 8, 32
    x = jax.random.normal(jax.random.PRNGKey(0), (batch, seq, hidden), dtype=jnp.float32)
    gamma = jnp.ones((hidden,), dtype=jnp.float32)   # nn.Parameter(torch.ones(x_size))
    beta = jnp.zeros((hidden,), dtype=jnp.float32)   # nn.Parameter(torch.zeros(x_size))
    y = jax.block_until_ready(layer_norm(x, gamma, beta))
    assert jnp.allclose(y, reference(x, gamma, beta), atol=1e-5, rtol=1e-5), "mismatch (base)"

    # Ragged-grid coverage, packed path: 40 packed rows with a forced 16-row tile.
    x2 = jax.random.normal(jax.random.PRNGKey(1), (4, 10, hidden), dtype=jnp.float32)
    y2 = jax.block_until_ready(layer_norm(x2, gamma, beta, row_tile=16))
    assert jnp.allclose(y2, reference(x2, gamma, beta), atol=1e-5, rtol=1e-5), "mismatch (ragged/packed)"

    # Ragged-grid coverage, plain path (H >= 128): 15 rows with a forced 8-row tile.
    hidden3 = 256
    x3 = jax.random.normal(jax.random.PRNGKey(2), (3, 5, hidden3), dtype=jnp.float32)
    g3 = jax.random.normal(jax.random.PRNGKey(3), (hidden3,), dtype=jnp.float32)
    b3 = jax.random.normal(jax.random.PRNGKey(4), (hidden3,), dtype=jnp.float32)
    y3 = jax.block_until_ready(layer_norm(x3, g3, b3, row_tile=8))
    assert jnp.allclose(y3, reference(x3, g3, b3), atol=1e-5, rtol=1e-5), "mismatch (ragged/plain)"

    print("KERNEL_OK")
</pallas_src>

<mosaic_0001>
module attributes {stable_mosaic.version = 11 : i64} {
  func.func @_packed_kernel(%arg0: i32, %arg1: memref<4x128xf32, #tpu.memory_space<vmem>>, %arg2: memref<1x128xf32, #tpu.memory_space<vmem>>, %arg3: memref<1x128xf32, #tpu.memory_space<vmem>>, %arg4: memref<128x128xf32, #tpu.memory_space<vmem>>, %arg5: memref<4x128xf32, #tpu.memory_space<vmem>>) attributes {dimension_semantics = [#tpu.dimension_semantics<parallel>], iteration_bounds = array<i64: 1>, scalar_prefetch = 0 : i64, scratch_operands = 0 : i64, tpu.core_type = #tpu.core_type<tc>, window_params = [{transform_indices = @transform_0, window_bounds = array<i64: 4, 128>}, {pipeline_mode = #tpu.pipeline_mode<synchronous>, transform_indices = @transform_1, window_bounds = array<i64: 1, 128>}, {pipeline_mode = #tpu.pipeline_mode<synchronous>, transform_indices = @transform_2, window_bounds = array<i64: 1, 128>}, {pipeline_mode = #tpu.pipeline_mode<synchronous>, transform_indices = @transform_3, window_bounds = array<i64: 128, 128>}, {transform_indices = @transform_4, window_bounds = array<i64: 4, 128>}]} {
    %c0 = arith.constant 0 : index
    %c0_0 = arith.constant 0 : index
    %0 = vector.load %arg1[%c0, %c0_0] : memref<4x128xf32, #tpu.memory_space<vmem>>, vector<4x128xf32>
    %c0_1 = arith.constant 0 : index
    %c0_2 = arith.constant 0 : index
    %1 = vector.load %arg2[%c0_1, %c0_2] : memref<1x128xf32, #tpu.memory_space<vmem>>, vector<1x128xf32>
    %c0_3 = arith.constant 0 : index
    %c0_4 = arith.constant 0 : index
    %2 = vector.load %arg3[%c0_3, %c0_4] : memref<1x128xf32, #tpu.memory_space<vmem>>, vector<1x128xf32>
    %c0_5 = arith.constant 0 : index
    %c0_6 = arith.constant 0 : index
    %3 = vector.load %arg4[%c0_5, %c0_6] : memref<128x128xf32, #tpu.memory_space<vmem>>, vector<128x128xf32>
    %cst = arith.constant dense<0.000000e+00> : vector<4x128xf32>
    %4 = tpu.matmul %0, %3, %cst {dimension_numbers = #tpu.dot_dimension_numbers<[1], [0], [0], [1], [0, 0, 1, 1], [], []>, precision = #tpu.contract_precision<fp32>} : vector<4x128xf32>, vector<128x128xf32>, vector<4x128xf32> -> vector<4x128xf32>
    %cst_7 = arith.constant 3.125000e-02 : f32
    %5 = vector.broadcast %cst_7 : f32 to vector<4x128xf32>
    %6 = arith.mulf %4, %5 : vector<4x128xf32>
    %7 = arith.subf %0, %6 : vector<4x128xf32>
    %8 = arith.mulf %7, %7 : vector<4x128xf32>
    %cst_8 = arith.constant dense<0.000000e+00> : vector<4x128xf32>
    %9 = tpu.matmul %8, %3, %cst_8 {dimension_numbers = #tpu.dot_dimension_numbers<[1], [0], [0], [1], [0, 0, 1, 1], [], []>, precision = #tpu.contract_precision<fp32>} : vector<4x128xf32>, vector<128x128xf32>, vector<4x128xf32> -> vector<4x128xf32>
    %cst_9 = arith.constant 0.0322580636 : f32
    %10 = vector.broadcast %cst_9 : f32 to vector<4x128xf32>
    %11 = arith.mulf %9, %10 : vector<4x128xf32>
    %12 = math.sqrt %11 : vector<4x128xf32>
    %cst_10 = arith.constant 9.99999997E-7 : f32
    %13 = vector.broadcast %cst_10 : f32 to vector<4x128xf32>
    %14 = arith.addf %12, %13 : vector<4x128xf32>
    %15 = tpu.reciprocal %14 : vector<4x128xf32> -> vector<4x128xf32>
    %16 = arith.mulf %7, %15 : vector<4x128xf32>
    %17 = vector.broadcast %1 : vector<1x128xf32> to vector<4x128xf32>
    %18 = arith.mulf %16, %17 : vector<4x128xf32>
    %19 = vector.broadcast %2 : vector<1x128xf32> to vector<4x128xf32>
    %20 = arith.addf %18, %19 : vector<4x128xf32>
    %c0_11 = arith.constant 0 : index
    %c0_12 = arith.constant 0 : index
    %21 = vector.load %arg5[%c0_11, %c0_12] : memref<4x128xf32, #tpu.memory_space<vmem>>, vector<4x128xf32>
    tpu.vector_store %arg5[%c0_11, %c0_12], %20 {strides = array<i32>} : memref<4x128xf32, #tpu.memory_space<vmem>>, vector<4x128xf32>,
    return
  }
  func.func @transform_0(%arg0: i32) -> (i32, i32) {
    %c0_i32 = arith.constant 0 : i32
    %c0_i32_0 = arith.constant 0 : i32
    return %arg0, %c0_i32 : i32, i32
  }
  func.func @transform_1(%arg0: i32) -> (i32, i32) {
    %c0_i32 = arith.constant 0 : i32
    %c0_i32_0 = arith.constant 0 : i32
    %c0_i32_1 = arith.constant 0 : i32
    return %c0_i32, %c0_i32_0 : i32, i32
  }
  func.func @transform_2(%arg0: i32) -> (i32, i32) {
    %c0_i32 = arith.constant 0 : i32
    %c0_i32_0 = arith.constant 0 : i32
    %c0_i32_1 = arith.constant 0 : i32
    return %c0_i32, %c0_i32_0 : i32, i32
  }
  func.func @transform_3(%arg0: i32) -> (i32, i32) {
    %c0_i32 = arith.constant 0 : i32
    %c0_i32_0 = arith.constant 0 : i32
    %c0_i32_1 = arith.constant 0 : i32
    return %c0_i32, %c0_i32_0 : i32, i32
  }
  func.func @transform_4(%arg0: i32) -> (i32, i32) {
    %c0_i32 = arith.constant 0 : i32
    %c0_i32_0 = arith.constant 0 : i32
    return %arg0, %c0_i32 : i32, i32
  }
}

</mosaic_0001>

<bundles_post_ra>
// kernel: tpu_custom_call.1
= control target key start
LH: loop header
LB: loop body
LE: loop exit
PB: predicated region body
PF: predicated region fallthrough
CT: control target
= control target key end

     0   :  { %9 = vsyncpa [#allocation3], 0  ;;  %s1376_s0 = inlined_call_operand.hbm [shape: f32[4,128], index: 0, kind: input, shape index: {}]   ;;  %s1377_s1 = inlined_call_operand.hbm [shape: f32[1,128], index: 1, kind: input, shape index: {}]   ;;  %s1378_s2 = inlined_call_operand.vmem [shape: f32[1,128], index: 2, kind: input, shape index: {}]   ;;  %s1379_s3 = inlined_call_operand.hbm [shape: f32[128,128], index: 3, kind: input, shape index: {}]   ;;  %s1380_s4 = inlined_call_operand.hbm [shape: f32[4,128], index: 4, kind: output, shape index: {}]  }
   0x1   :  { %10 = vsyncpa [#allocation6], 0  ;;  %s28_s17 = sshll.u32 %s1377_s1, 4  ;;  %s29_s17 = int_to_ptr.hbm [resolvable:$true] %s28_s17 }
   0x2   :  { %11 = vsyncpa [#allocation4], 0  ;;  %s935_s18 = smov [#allocation5]   ;;  %s17_s22 = sshll.u32 %s1376_s0, 4  ;;  %s18_s22 = int_to_ptr.hbm [resolvable:$true] %s17_s22 }
   0x3   :  { %s30_s19 = sshll.u32 %s935_s18, 4  ;;  %s936_s23 = smov [#allocation2]   ;;  %s31_s19 = int_to_ptr.vmem [resolvable:$true] %s30_s19 }
   0x4   :  { %33 = dma.hbm_to_vmem [thread:$0]  %s29_s17, 16, %s31_s19, [#allocation6]  }
   0x5   :  { %s19_s24 = sshll.u32 %s936_s23, 4  ;;  %s40_s27 = sshll.u32 %s1379_s3, 4  ;;  %s20_s24 = int_to_ptr.vmem [resolvable:$true] %s19_s24  ;;  %s41_s27 = int_to_ptr.hbm [resolvable:$true] %s40_s27 }
   0x6   :  { %22 = dma.hbm_to_vmem [thread:$0]  %s18_s22, 64, %s20_s24, [#allocation3]  }
   0x7   :  { %s937_s1 = smov [#allocation7]   ;;  %s938_s29 = smov 128  }
   0x8   :  { %s42_s28 = sshll.u32 %s937_s1, 4  ;;  %s939_s30 = smov 8   ;;  %s43_s28 = int_to_ptr.vmem [resolvable:$true] %s42_s28 }
   0x9   :  { %48 = dma.hbm_to_vmem [thread:$0]  %s41_s27, 2048, %s43_s28, [#allocation6], %s938_s29, %s938_s29, %s939_s30  }
   0xa   :  { %929 = dma.done.wait [#allocation3], 64  }
   0xb   :  { %930 = vsyncadd [#allocation3], 4294967232 }
   0xc   :  { %931 = dma.done.wait [#allocation6], 2064  }
   0xd   :  { %932 = vsyncadd [#allocation6], 4294965232  ;;  %v79_v0 = vld [vmem:[#allocation7 + $0x78] sm:$0xff]  ;;  %v78_v1 = vld [vmem:[#allocation7 + $0x70] sm:$0xff]  ;;  %s940_s5 = smov [#allocation8]   ;;  %s810_s9 = sshll.u32 %s1380_s4, 4  ;;  %s811_s9 = int_to_ptr.hbm [resolvable:$true] %s810_s9 }
   0xe   :  { %v77_v2 = vld [vmem:[#allocation7 + $0x68] sm:$0xff]  ;;  %v975_v3 = vand.u32 4294901760, %v79_v0  ;;  %v977_v4 = vand.u32 4294901760, %v78_v1  ;;  %v76_v6 = vld [vmem:[#allocation7 + $0x60] sm:$0xff]  ;;  %v75_v7 = vld [vmem:[#allocation7 + $0x58] sm:$0xff]  ;;  %s808_s6 = sshll.u32 %s940_s5, 4  ;;  %s809_s6 = int_to_ptr.vmem [resolvable:$true] %s808_s6 }
   0xf   :  { %v979_v5 = vand.u32 4294901760, %v77_v2  ;;  %v74_v8 = vld [vmem:[#allocation7 + $0x50] sm:$0xff]  ;;  %v981_v9 = vand.u32 4294901760, %v76_v6  ;;  %v983_v10 = vand.u32 4294901760, %v75_v7  ;;  %v73_v12 = vld [vmem:[#allocation7 + $0x48] sm:$0xff]  ;;  %v72_v13 = vld [vmem:[#allocation7 + $0x40] sm:$0xff] }
  0x10   :  { %v985_v11 = vand.u32 4294901760, %v74_v8  ;;  %81 = vmatpush.msra.mxu0 %v975_v3  ;;  %v989_v14 = vsub.f32 %v79_v0, %v975_v3  ;;  %v992_v15 = vsub.f32 %v78_v1, %v977_v4  ;;  %v997_v17 = vand.u32 4294901760, %v73_v12  ;;  %v71_v18 = vld [vmem:[#allocation7 + $0x38] sm:$0xff]  ;;  %277 = vmatpush.msra.mxu3 %v975_v3  ;;  %v70_v26 = vld [vmem:[#allocation7 + $0x30] sm:$0xff]  ;;  %v69_v36 = vld [vmem:[#allocation7 + $0x28] sm:$0xff] }
  0x11   :  { %v995_v16 = vsub.f32 %v77_v2, %v979_v5  ;;  %v1001_v19 = vsub.f32 %v76_v6, %v981_v9  ;;  %v1004_v20 = vsub.f32 %v75_v7, %v983_v10  ;;  %v1019_v25 = vand.u32 4294901760, %v72_v13  ;;  %v68_v42 = vld [vmem:[#allocation7 + $0x20] sm:$0xff]  ;;  %v67_v47 = vld [vmem:[#allocation7 + $0x18] sm:$0xff]  ;;  %v66_v55 = vld [vmem:[#allocation7 + $0x10] sm:$0xff] }
  0x12   :  { %v1007_v21 = vsub.f32 %v74_v8, %v985_v11  ;;  %83 = vmatpush.msra.mxu0 %v977_v4  ;;  %v1011_v22 = vand.u32 4294901760, %v989_v14  ;;  %v1014_v23 = vand.u32 4294901760, %v992_v15  ;;  %224 = vmatpush.msra.mxu2 %v989_v14  ;;  %v1025_v28 = vand.u32 4294901760, %v71_v18  ;;  %v65_v60 = vld [vmem:[#allocation7 + $0x8] sm:$0xff]  ;;  %v64_v1 = vld [vmem:[#allocation7] sm:$0xff] }
  0x13   :  { %v1017_v24 = vand.u32 4294901760, %v995_v16  ;;  %v1023_v27 = vand.u32 4294901760, %v1001_v19  ;;  %v1028_v29 = vsub.f32 %v73_v12, %v997_v17  ;;  %279 = vmatpush.msra.mxu3 %v977_v4  ;;  %v1039_v33 = vand.u32 4294901760, %v1004_v20  ;;  %v1129_v7 = vld [vmem:[#allocation2] sm:$0xf] }
  0x14   :  { %85 = vmatpush.msra.mxu0 %v979_v5  ;;  %v124_v30 = vsub.f32 %v989_v14, %v1011_v22  ;;  %v130_v31 = vsub.f32 %v992_v15, %v1014_v23  ;;  %227 = vmatpush.msra.mxu2 %v992_v15  ;;  %v1043_v34 = vand.u32 4294901760, %v1007_v21  ;;  %v1045_v35 = vand.u32 4294901760, %v70_v26  ;;  %1395 = vst [vmem:[#allocation18_spill] sm:$0xff] %v1129_v7 }
  0x15   :  { %v136_v32 = vsub.f32 %v995_v16, %v1017_v24  ;;  %281 = vmatpush.msra.mxu3 %v979_v5  ;;  %v142_v39 = vsub.f32 %v1001_v19, %v1023_v27  ;;  %v1056_v40 = vsub.f32 %v72_v13, %v1019_v25  ;;  %v1060_v41 = vand.u32 4294901760, %v1028_v29 }
  0x16   :  { %v1048_v37 = vand.u32 4294901760, %v124_v30  ;;  %87 = vmatpush.msra.mxu0 %v981_v9  ;;  %v1051_v38 = vand.u32 4294901760, %v130_v31  ;;  %230 = vmatpush.msra.mxu2 %v995_v16  ;;  %v148_v44 = vsub.f32 %v1004_v20, %v1039_v33  ;;  %v1069_v45 = vand.u32 4294901760, %v69_v36 }
  0x17   :  { %1389 = vst [vmem:[#allocation12_spill] sm:$0xff] %v1056_v40  ;;  %283 = vmatpush.msra.mxu3 %v981_v9  ;;  %v1065_v43 = vand.u32 4294901760, %v136_v32  ;;  %v1072_v46 = vsub.f32 %v71_v18, %v1025_v28  ;;  %v154_v48 = vsub.f32 %v1007_v21, %v1043_v34  ;;  %v1080_v49 = vand.u32 4294901760, %v142_v39 }
  0x18   :  { %126 = vmatpush.msra.mxu1 %v1048_v37  ;;  %89 = vmatpush.msra.mxu0 %v983_v10  ;;  %v1083_v50 = vand.u32 4294901760, %v1056_v40  ;;  %v1085_v51 = vand.u32 4294901760, %v68_v42  ;;  %v1088_v52 = vsub.f32 %v70_v26, %v1045_v35  ;;  %v160_v53 = vsub.f32 %v1028_v29, %v1060_v41 }
  0x19   :  { %1390 = vst [vmem:[#allocation13_spill] sm:$0xff] %v1072_v46  ;;  %233 = vmatpush.msra.mxu2 %v1001_v19  ;;  %285 = vmatpush.msra.mxu3 %v983_v10  ;;  %v1092_v54 = vand.u32 4294901760, %v67_v47  ;;  %v1098_v56 = vand.u32 4294901760, %v148_v44  ;;  %v1101_v57 = vand.u32 4294901760, %v1072_v46  ;;  %v1104_v58 = vsub.f32 %v69_v36, %v1069_v45 }
  0x1a   :  { %132 = vmatpush.msra.mxu1 %v1051_v38  ;;  %91 = vmatpush.msra.mxu0 %v985_v11  ;;  %1391 = vst [vmem:[#allocation14_spill] sm:$0xff] %v1088_v52  ;;  %v1106_v59 = vand.u32 4294901760, %v154_v48  ;;  %v166_v61 = vsub.f32 %v1056_v40, %v1083_v50  ;;  %v1115_v62 = vand.u32 4294901760, %v1088_v52  ;;  %v1117_v63 = vand.u32 4294901760, %v66_v55 }
  0x1b   :  { %236 = vmatpush.msra.mxu2 %v1004_v20  ;;  %287 = vmatpush.msra.mxu3 %v985_v11  ;;  %1392 = vst [vmem:[#allocation15_spill] sm:$0xff] %v1104_v58  ;;  %v1120_v0 = vsub.f32 %v68_v42, %v1085_v51  ;;  %v1122_v2 = vand.u32 4294901760, %v160_v53  ;;  %v1125_v6 = vsub.f32 %v67_v47, %v1092_v54  ;;  %v1136_v12 = vand.u32 4294901760, %v1104_v58 }
  0x1c   :  { %138 = vmatpush.msra.mxu1 %v1065_v43  ;;  %93 = vmatpush.msra.mxu0 %v997_v17  ;;  %v172_v8 = vsub.f32 %v1072_v46, %v1101_v57  ;;  %v1138_v13 = vand.u32 4294901760, %v65_v60  ;;  %v1141_v18 = vand.u32 4294901760, %v1129_v7  ;;  %v1143_v26 = vand.u32 4294901760, %v64_v1 }
  0x1d   :  { %239 = vmatpush.msra.mxu2 %v1007_v21  ;;  %289 = vmatpush.msra.mxu3 %v997_v17  ;;  %1393 = vst [vmem:[#allocation16_spill] sm:$0xff] %v1120_v0  ;;  %v1149_v30 = vand.u32 4294901760, %v166_v61  ;;  %v178_v31 = vsub.f32 %v1088_v52, %v1115_v62  ;;  %v1154_v32 = vand.u32 4294901760, %v1120_v0  ;;  %v1157_v36 = vsub.f32 %v66_v55, %v1117_v63 }
  0x1e   :  { %144 = vmatpush.msra.mxu1 %v1080_v49  ;;  %95 = vmatpush.msra.mxu0 %v1019_v25  ;;  %1394 = vst [vmem:[#allocation17_spill] sm:$0xff] %v1125_v6  ;;  %v1160_v39 = vand.u32 4294901760, %v1125_v6  ;;  %v1166_v42 = vand.u32 4294901760, %v172_v8  ;;  %v184_v44 = vsub.f32 %v1104_v58, %v1136_v12  ;;  %v1171_v47 = vsub.f32 %v65_v60, %v1138_v13 }
  0x1f   :  { %242 = vmatpush.msra.mxu2 %v1028_v29  ;;  %291 = vmatpush.msra.mxu3 %v1019_v25  ;;  %1396 = vst [vmem:[#allocation19_spill] sm:$0xff] %v1157_v36  ;;  %v113_v48 = vsub.f32 %v1129_v7, %v1141_v18  ;;  %v1179_v53 = vand.u32 4294901760, %v178_v31  ;;  %v190_v55 = vsub.f32 %v1120_v0, %v1154_v32  ;;  %v1184_v61 = vand.u32 4294901760, %v1157_v36 }
  0x20   :  { %150 = vmatpush.msra.mxu1 %v1098_v56  ;;  %97 = vmatpush.msra.mxu0 %v1025_v28  ;;  %v1187_v60 = vsub.f32 %v64_v1, %v1143_v26  ;;  %v1193_v8 = vand.u32 4294901760, %v184_v44  ;;  %v196_v31 = vsub.f32 %v1125_v6, %v1160_v39  ;;  %v1198_v7 = vand.u32 4294901760, %v1171_v47 }
  0x21   :  { %245 = vmatpush.msra.mxu2 %v1056_v40  ;;  %293 = vmatpush.msra.mxu3 %v1025_v28  ;;  %v1204_v1 = vand.u32 4294901760, %v190_v55  ;;  %v202_v44 = vsub.f32 %v1157_v36, %v1184_v61 }
  0x22   :  { %156 = vmatpush.msra.mxu1 %v1106_v59  ;;  %99 = vmatpush.msra.mxu0 %v1045_v35  ;;  %v208_v55 = vsub.f32 %v1171_v47, %v1198_v7 }
  0x23   :  { %248 = vmatpush.msra.mxu2 %v1072_v46  ;;  %295 = vmatpush.msra.mxu3 %v1045_v35 }
  0x24   :  { %162 = vmatpush.msra.mxu1 %v1122_v2  ;;  %101 = vmatpush.msra.mxu0 %v1069_v45 }
  0x25   :  { %251 = vmatpush.msra.mxu2 %v1088_v52  ;;  %297 = vmatpush.msra.mxu3 %v1069_v45  ;;  %v114_v52 = vand.u32 4294901760, %v113_v48 }
  0x26   :  { %168 = vmatpush.msra.mxu1 %v1149_v30  ;;  %103 = vmatpush.msra.mxu0 %v1085_v51 }
  0x27   :  { %254 = vmatpush.msra.mxu2 %v1104_v58  ;;  %299 = vmatpush.msra.mxu3 %v1085_v51  ;;  %v1209_v58 = vand.u32 4294901760, %v1187_v60  ;;  %v115_v46 = vsub.f32 %v113_v48, %v114_v52 }
  0x28   :  { %174 = vmatpush.msra.mxu1 %v1166_v42  ;;  %105 = vmatpush.msra.mxu0 %v1092_v54 }
  0x29   :  { %257 = vmatpush.msra.mxu2 %v1120_v0  ;;  %301 = vmatpush.msra.mxu3 %v1092_v54  ;;  %v1215_v0 = vand.u32 4294901760, %v196_v31  ;;  %v214_v40 = vsub.f32 %v1187_v60, %v1209_v58  ;;  %v1230_v31 = vand.u32 4294901760, %v208_v55 }
  0x2a   :  { %180 = vmatpush.msra.mxu1 %v1179_v53  ;;  %107 = vmatpush.msra.mxu0 %v1117_v63 }
  0x2b   :  { %260 = vmatpush.msra.mxu2 %v1125_v6  ;;  %303 = vmatpush.msra.mxu3 %v1117_v63  ;;  %v1223_v6 = vand.u32 4294901760, %v202_v44  ;;  %v1236_v44 = vand.u32 4294901760, %v214_v40 }
  0x2c   :  { %186 = vmatpush.msra.mxu1 %v1193_v8  ;;  %109 = vmatpush.msra.mxu0 %v1138_v13 }
  0x2d   :  { %263 = vmatpush.msra.mxu2 %v1157_v36  ;;  %305 = vmatpush.msra.mxu3 %v1138_v13  ;;  %v116_v36 = vand.u32 4294901760, %v115_v46 }
  0x2e   :  { %192 = vmatpush.msra.mxu1 %v1204_v1  ;;  %111 = vmatpush.msra.mxu0 %v1143_v26 }
  0x2f   :  { %266 = vmatpush.msra.mxu2 %v1171_v47  ;;  %307 = vmatpush.msra.mxu3 %v1143_v26 }
  0x30   :  { %318 = vmatpush.msrb.mxu0 %v1011_v22  ;;  %198 = vmatpush.msra.mxu1 %v1215_v0 }
  0x31   :  { %269 = vmatpush.msra.mxu2 %v1187_v60  ;;  %311 = vmatmul.f32.vlgmr.msra.gmra.mxu3 %v114_v52 }
  0x32   :  { %322 = vmatpush.msrb.mxu0 %v1014_v23  ;;  %204 = vmatpush.msra.mxu1 %v1223_v6 }
  0x33   :  { %272 = vmatmul.f32.vlgmr.msra.gmra.mxu2 %v113_v48  ;;  %117 = vmatmul.f32.vlgmr.msra.gmra.mxu0 %v116_v36 }
  0x34   :  { %326 = vmatpush.msrb.mxu0 %v1017_v24  ;;  %210 = vmatpush.msra.mxu1 %v1230_v31 }
  0x35   :  { %470 = vmatpush.msrb.mxu3 %v1048_v37  ;;  %425 = vmatpush.msrb.mxu2 %v975_v3 }
  0x36   :  { %330 = vmatpush.msrb.mxu0 %v1023_v27  ;;  %216 = vmatpush.msra.mxu1 %v1236_v44 }
  0x37   :  { %218 = vmatmul.f32.vlgmr.msra.gmra.mxu1 %v1141_v18  ;;  %476 = vmatpush.msrb.mxu3 %v1051_v38 }
  0x38   :  { %385 = vmatpush.msrb.mxu1 %v975_v3  ;;  %334 = vmatpush.msrb.mxu0 %v1039_v33 }
  0x39   :  { %482 = vmatpush.msrb.mxu3 %v1065_v43  ;;  %427 = vmatpush.msrb.mxu2 %v977_v4 }
  0x3a   :  { %387 = vmatpush.msrb.mxu1 %v977_v4  ;;  %338 = vmatpush.msrb.mxu0 %v1043_v34 }
  0x3b   :  { %488 = vmatpush.msrb.mxu3 %v1080_v49  ;;  %429 = vmatpush.msrb.mxu2 %v979_v5 }
  0x3c   :  { %389 = vmatpush.msrb.mxu1 %v979_v5  ;;  %342 = vmatpush.msrb.mxu0 %v1060_v41 }
  0x3d   :  { %494 = vmatpush.msrb.mxu3 %v1098_v56  ;;  %431 = vmatpush.msrb.mxu2 %v981_v9 }
  0x3e   :  { %391 = vmatpush.msrb.mxu1 %v981_v9  ;;  %346 = vmatpush.msrb.mxu0 %v1083_v50 }
  0x3f   :  { %500 = vmatpush.msrb.mxu3 %v1106_v59  ;;  %433 = vmatpush.msrb.mxu2 %v983_v10 }
  0x40   :  { %393 = vmatpush.msrb.mxu1 %v983_v10  ;;  %350 = vmatpush.msrb.mxu0 %v1101_v57 }
  0x41   :  { %506 = vmatpush.msrb.mxu3 %v1122_v2  ;;  %435 = vmatpush.msrb.mxu2 %v985_v11 }
  0x42   :  { %395 = vmatpush.msrb.mxu1 %v985_v11  ;;  %354 = vmatpush.msrb.mxu0 %v1115_v62 }
  0x43   :  { %512 = vmatpush.msrb.mxu3 %v1149_v30  ;;  %437 = vmatpush.msrb.mxu2 %v997_v17 }
  0x44   :  { %397 = vmatpush.msrb.mxu1 %v997_v17  ;;  %358 = vmatpush.msrb.mxu0 %v1136_v12 }
  0x45   :  { %518 = vmatpush.msrb.mxu3 %v1166_v42  ;;  %439 = vmatpush.msrb.mxu2 %v1019_v25 }
  0x46   :  { %399 = vmatpush.msrb.mxu1 %v1019_v25  ;;  %362 = vmatpush.msrb.mxu0 %v1154_v32 }
  0x47   :  { %524 = vmatpush.msrb.mxu3 %v1179_v53  ;;  %441 = vmatpush.msrb.mxu2 %v1025_v28 }
  0x48   :  { %401 = vmatpush.msrb.mxu1 %v1025_v28  ;;  %366 = vmatpush.msrb.mxu0 %v1160_v39 }
  0x49   :  { %530 = vmatpush.msrb.mxu3 %v1193_v8  ;;  %443 = vmatpush.msrb.mxu2 %v1045_v35  ;;  %v827_v8 = vld [vmem:[#allocation5] ss:$0 sm:$0xff] }
  0x4a   :  { %403 = vmatpush.msrb.mxu1 %v1045_v35  ;;  %370 = vmatpush.msrb.mxu0 %v1184_v61 }
  0x4b   :  { %536 = vmatpush.msrb.mxu3 %v1204_v1  ;;  %445 = vmatpush.msrb.mxu2 %v1069_v45 }
  0x4c   :  { %405 = vmatpush.msrb.mxu1 %v1069_v45  ;;  %374 = vmatpush.msrb.mxu0 %v1198_v7 }
  0x4d   :  { %542 = vmatpush.msrb.mxu3 %v1215_v0  ;;  %447 = vmatpush.msrb.mxu2 %v1085_v51 }
  0x4e   :  { %407 = vmatpush.msrb.mxu1 %v1085_v51  ;;  %378 = vmatpush.msrb.mxu0 %v1209_v58 }
  0x4f   :  { %380 = vmatmul.f32.vlgmr.msrb.gmra.mxu0 %v1141_v18  ;;  %548 = vmatpush.msrb.mxu3 %v1223_v6 }
  0x50   :  { %409 = vmatpush.msrb.mxu1 %v1092_v54  ;;  %568 = vmatpush.msra.mxu0 %v989_v14  ;;  %v1403_v14 = vld [vmem:[#allocation19_spill] sm:$0xff] }
  0x51   :  { %554 = vmatpush.msrb.mxu3 %v1230_v31  ;;  %449 = vmatpush.msrb.mxu2 %v1092_v54  ;;  %v828_v31 = vld [vmem:[%s1378_s2] ss:$0 sm:$0xff] }
  0x52   :  { %411 = vmatpush.msrb.mxu1 %v1117_v63  ;;  %571 = vmatpush.msra.mxu0 %v992_v15 }
  0x53   :  { %560 = vmatpush.msrb.mxu3 %v1236_v44  ;;  %451 = vmatpush.msrb.mxu2 %v1117_v63 }
  0x54   :  { %413 = vmatpush.msrb.mxu1 %v1138_v13  ;;  %574 = vmatpush.msra.mxu0 %v995_v16 }
  0x55   :  { %729 = vmatpush.msra.mxu3 %v975_v3  ;;  %453 = vmatpush.msrb.mxu2 %v1138_v13 }
  0x56   :  { %415 = vmatpush.msrb.mxu1 %v1143_v26  ;;  %577 = vmatpush.msra.mxu0 %v1001_v19 }
  0x57   :  { %417 = vmatmul.f32.vlgmr.msrb.gmra.mxu1 %v1141_v18  ;;  %731 = vmatpush.msra.mxu3 %v977_v4 }
  0x58   :  { %621 = vmatpush.msra.mxu1 %v975_v3  ;;  %580 = vmatpush.msra.mxu0 %v1004_v20  ;;  %v1397_v3 = vld [vmem:[#allocation12_spill] sm:$0xff] }
  0x59   :  { %733 = vmatpush.msra.mxu3 %v979_v5  ;;  %455 = vmatpush.msrb.mxu2 %v1143_v26 }
  0x5a   :  { %623 = vmatpush.msra.mxu1 %v977_v4  ;;  %583 = vmatpush.msra.mxu0 %v1007_v21  ;;  %v1398_v4 = vld [vmem:[#allocation13_spill] sm:$0xff] }
  0x5b   :  { %735 = vmatpush.msra.mxu3 %v981_v9  ;;  %662 = vmatpush.msra.mxu2 %v1011_v22 }
  0x5c   :  { %625 = vmatpush.msra.mxu1 %v979_v5  ;;  %586 = vmatpush.msra.mxu0 %v1028_v29  ;;  %v1399_v5 = vld [vmem:[#allocation14_spill] sm:$0xff] }
  0x5d   :  { %737 = vmatpush.msra.mxu3 %v983_v10  ;;  %666 = vmatpush.msra.mxu2 %v1014_v23  ;;  %v1404_v29 = vld [vmem:[#allocation18_spill] sm:$0xff] }
  0x5e   :  { %627 = vmatpush.msra.mxu1 %v981_v9  ;;  %589 = vmatpush.msra.mxu0 %v1397_v3  ;;  %v1400_v9 = vld [vmem:[#allocation15_spill] sm:$0xff] }
  0x5f   :  { %739 = vmatpush.msra.mxu3 %v985_v11  ;;  %670 = vmatpush.msra.mxu2 %v1017_v24 }
  0x60   :  { %629 = vmatpush.msra.mxu1 %v983_v10  ;;  %592 = vmatpush.msra.mxu0 %v1398_v4  ;;  %v1401_v10 = vld [vmem:[#allocation16_spill] sm:$0xff] }
  0x61   :  { %741 = vmatpush.msra.mxu3 %v997_v17  ;;  %674 = vmatpush.msra.mxu2 %v1023_v27 }
  0x62   :  { %631 = vmatpush.msra.mxu1 %v985_v11  ;;  %595 = vmatpush.msra.mxu0 %v1399_v5  ;;  %v1402_v11 = vld [vmem:[#allocation17_spill] sm:$0xff] }
  0x63   :  { %743 = vmatpush.msra.mxu3 %v1019_v25  ;;  %678 = vmatpush.msra.mxu2 %v1039_v33 }
  0x64   :  { %633 = vmatpush.msra.mxu1 %v997_v17  ;;  %598 = vmatpush.msra.mxu0 %v1400_v9 }
  0x65   :  { %745 = vmatpush.msra.mxu3 %v1025_v28  ;;  %682 = vmatpush.msra.mxu2 %v1043_v34 }
  0x66   :  { %635 = vmatpush.msra.mxu1 %v1019_v25  ;;  %601 = vmatpush.msra.mxu0 %v1401_v10 }
  0x67   :  { %747 = vmatpush.msra.mxu3 %v1045_v35  ;;  %686 = vmatpush.msra.mxu2 %v1060_v41 }
  0x68   :  { %637 = vmatpush.msra.mxu1 %v1025_v28  ;;  %604 = vmatpush.msra.mxu0 %v1402_v11 }
  0x69   :  { %749 = vmatpush.msra.mxu3 %v1069_v45  ;;  %690 = vmatpush.msra.mxu2 %v1083_v50 }
  0x6a   :  { %639 = vmatpush.msra.mxu1 %v1045_v35  ;;  %607 = vmatpush.msra.mxu0 %v1403_v14 }
  0x6b   :  { %751 = vmatpush.msra.mxu3 %v1085_v51  ;;  %694 = vmatpush.msra.mxu2 %v1101_v57 }
  0x6c   :  { %641 = vmatpush.msra.mxu1 %v1069_v45  ;;  %610 = vmatpush.msra.mxu0 %v1171_v47 }
  0x6d   :  { %753 = vmatpush.msra.mxu3 %v1092_v54  ;;  %698 = vmatpush.msra.mxu2 %v1115_v62 }
  0x6e   :  { %643 = vmatpush.msra.mxu1 %v1085_v51  ;;  %613 = vmatpush.msra.mxu0 %v1187_v60 }
  0x6f   :  { %755 = vmatpush.msra.mxu3 %v1117_v63  ;;  %702 = vmatpush.msra.mxu2 %v1136_v12 }
  0x70   :  { %645 = vmatpush.msra.mxu1 %v1092_v54 }
  0x71   :  { %757 = vmatpush.msra.mxu3 %v1138_v13  ;;  %706 = vmatpush.msra.mxu2 %v1154_v32 }
  0x72   :  { %647 = vmatpush.msra.mxu1 %v1117_v63 }
  0x73   :  { %759 = vmatpush.msra.mxu3 %v1143_v26  ;;  %710 = vmatpush.msra.mxu2 %v1160_v39 }
  0x74   :  { %649 = vmatpush.msra.mxu1 %v1138_v13 }
  0x75   :  { %714 = vmatpush.msra.mxu2 %v1184_v61 }
  0x76   :  { %651 = vmatpush.msra.mxu1 %v1143_v26 }
  0x77   :  { %718 = vmatpush.msra.mxu2 %v1198_v7 }
  0x79   :  { %722 = vmatpush.msra.mxu2 %v1209_v58 }
  0xb0   :  { %v118_v16 = vpop.f32.mrf.mxu0 }
  0xb4   :  { %v219_v15 = vpop.f32.mrf.mxu1  ;;  %v312_v21 = vpop.f32.mrf.mxu3 }
  0xb5   :  { %v220_v17 = vadd.f32 %v219_v15, %v118_v16 }
  0xb6   :  { %v273_v19 = vpop.f32.mrf.mxu2 }
  0xb7   :  { %v274_v20 = vadd.f32 %v273_v19, %v220_v17 }
  0xb9   :  { %v313_v22 = vadd.f32 %v312_v21, %v274_v20 }
  0xcc   :  { %v381_v23 = vpop.f32.mrf.mxu0 }
  0xcd   :  { %v382_v24 = vadd.f32 %v381_v23, %v313_v22 }
  0xd4   :  { %v418_v25 = vpop.f32.mrf.mxu1 }
  0xd5   :  { %v419_v27 = vadd.f32 %v418_v25, %v382_v24 }
  0xd7   :  { %v421_v28 = vmul.f32 0.03125, %v419_v27 }
  0xd9   :  { %v422_v33 = vsub.f32 %v1404_v29, %v421_v28 }
  0xdb   :  { %v423_v34 = vmul.f32 %v422_v33, %v422_v33 }
  0xdd   :  { %v456_v35 = vand.u32 4294901760, %v423_v34 }
  0xdf   :  { %v457_v37 = vsub.f32 %v423_v34, %v456_v35  ;;  %562 = vmatmul.f32.vlgmr.msrb.gmra.mxu3 %v456_v35 }
  0xe1   :  { %616 = vmatmul.f32.vlgmr.msra.gmra.mxu0 %v457_v37  ;;  %v458_v38 = vand.u32 4294901760, %v457_v37 }
  0xe3   :  { %655 = vmatmul.f32.vlgmr.msra.gmra.mxu1 %v458_v38  ;;  %v459_v40 = vsub.f32 %v457_v37, %v458_v38 }
  0xe5   :  { %v460_v41 = vand.u32 4294901760, %v459_v40 }
  0xe7   :  { %461 = vmatmul.f32.vlgmr.msrb.gmra.mxu2 %v460_v41  ;;  %761 = vmatmul.f32.vlgmr.msra.gmra.mxu3 %v456_v35 }
  0xef   :  { %724 = vmatmul.f32.vlgmr.msra.gmra.mxu2 %v456_v35 }
 0x15e   :  { %v617_v49 = vpop.f32.mrf.mxu0 }
 0x160   :  { %v656_v51 = vpop.f32.mrf.mxu1 }
 0x162   :  { %v563_v43 = vpop.f32.mrf.mxu3 }
 0x16a   :  { %v462_v45 = vpop.f32.mrf.mxu2  ;;  %v762_v57 = vpop.f32.mrf.mxu3 }
 0x16b   :  { %v564_v46 = vadd.f32 %v563_v43, %v462_v45 }
 0x16d   :  { %v618_v50 = vadd.f32 %v617_v49, %v564_v46 }
 0x16f   :  { %v657_v52 = vadd.f32 %v656_v51, %v618_v50 }
 0x172   :  { %v725_v54 = vpop.f32.mrf.mxu2 }
 0x173   :  { %v726_v56 = vadd.f32 %v725_v54, %v657_v52 }
 0x175   :  { %v763_v58 = vadd.f32 %v762_v57, %v726_v56 }
 0x177   :  { %v765_v59 = vmul.f32 0.032258064, %v763_v58 }
 0x179   :  { %829 = vrsqrt.f32 %v765_v59  ;;  %vm773_vm0 = vcmp.eq.f32.partialorder %v765_v59, inf  ;;  %v776_v13 = vand.u32 2147483648, %v765_v59  ;;  %vm775_vm1 = vcmp.eq.f32.partialorder %v765_v59, 0.0 }
 0x17f   :  { %v830_v62 = vpop.eup %829 }
 0x180   :  { %v767_v63 = vmul.f32 %v830_v62, %v765_v59 }
 0x182   :  { %v768_v0 = vmul.f32 %v830_v62, %v767_v63 }
 0x184   :  { %v769_v2 = vmul.f32 0.5, %v768_v0 }
 0x186   :  { %v770_v6 = vsub.f32 1.5, %v769_v2 }
 0x188   :  { %v771_v7 = vmul.f32 %v830_v62, %v770_v6 }
 0x18a   :  { %v772_v12 = vmul.f32 %v771_v7, %v765_v59 }
 0x18c   :  { %v774_v18 = vsel %vm773_vm0, %v765_v59, %v772_v12 }
 0x18d   :  { %v777_v26 = vsel %vm775_vm1, %v776_v13, %v774_v18 }
 0x18e   :  { %v778_v30 = vadd.f32 1e-06, %v777_v26 }
 0x190   :  { %831 = vrcp.f32 %v778_v30  ;;  %v790_v42 = vand.u32 2147483648, %v778_v30  ;;  %v788_v48 = vand.u32 2147483647, %v778_v30  ;;  %vm784_vm3 = vweird.f32 %v778_v30 }
 0x192   :  { %v791_v61 = vor.u32 1.1754944e-38, %v790_v42  ;;  %vm789_vm5 = vcmp.eq.f32.partialorder %v788_v48, 8.507059e+37 }
 0x196   :  { %v832_v32 = vpop.eup %831 }
 0x197   :  { %v780_v36 = vmul.f32 %v832_v32, %v778_v30  ;;  %vm785_vm2 = vweird.f32 %v832_v32 }
 0x198   :  { %vm786_vm4 = vmor %vm784_vm3, %vm785_vm2 }
 0x199   :  { %v781_v39 = vsub.f32 1.0, %v780_v36 }
 0x19b   :  { %v782_v47 = vmul.f32 %v832_v32, %v781_v39 }
 0x19d   :  { %v783_v53 = vadd.f32 %v832_v32, %v782_v47 }
 0x19f   :  { %v787_v60 = vsel %vm786_vm4, %v832_v32, %v783_v53 }
 0x1a0   :  { %v792_v1 = vsel %vm789_vm5, %v791_v61, %v787_v60 }
 0x1a1   :  { %v793_v55 = vmul.f32 %v792_v1, %v422_v33 }
 0x1a3   :  { %v797_v44 = vmul.f32 %v827_v8, %v793_v55 }
 0x1a5   :  { %v801_v3 = vadd.f32 %v828_v31, %v797_v44 }
 0x1a7   :  { %802 = vst [vmem:[#allocation8] sm:$0xf] %v801_v3 }
 0x1a8   :  { %813 = dma.vmem_to_hbm [thread:$0]  %s809_s6, 64, %s811_s9, [#allocation4]  }
 0x1a9   :  { %933 = dma.done.wait [#allocation4], 64  }
 0x1aa   :  { %934 = vsyncadd [#allocation4], 4294967232 }
 0x1ab   :  { %818 = vsyncpa [#allocation3], 1 }
 0x1ac   :  { %819 = vsyncpa [#allocation6], 1 }
 0x1ad   :  { %820 = vsyncpa [#allocation4], 1 }

</bundles_post_ra>
